<compile_context>
chip_gen: v7x
topology: tpu7x:2x2x1
jax: 0.10.0
libtpu: 0.0.40
codegen_flags: <defaults>
</compile_context>

<pallas_src>
import math

import jax
import jax.numpy as jnp
from jax.experimental import pallas as pl
from jax.experimental.pallas import tpu as pltpu

_LANE = 128


def _hswish_kernel(x_ref, o_ref):
    x = x_ref[...].astype(jnp.float32)
    # relu6(x + 3) = clamp(x + 3, 0, 6);  hswish = x * relu6(x + 3) / 6
    r6 = jnp.clip(x + 3.0, 0.0, 6.0)
    o_ref[...] = (x * r6 * (1.0 / 6.0)).astype(o_ref.dtype)


def _round_up(a: int, b: int) -> int:
    return (a + b - 1) // b * b


def _sublane_granularity(dtype) -> int:
    return {4: 8, 2: 16, 1: 32}.get(jnp.dtype(dtype).itemsize, 8)


def _pick_tiles(shape3, dtype, target_f32_bytes: int, min_grid_steps: int):
    """Pick (tl, th, tw) block dims for a (L, H, W) view.

    The last two block dims are always either the full array dims or
    sublane/lane-aligned multiples, so the (8,128) tiling constraint holds and
    no relayout of the minor dims is ever required.
    """
    L, H, W = shape3
    sub = _sublane_granularity(dtype)

    # --- lane (last) dim: keep full width unless a single (sub, W) slice
    #     already blows the budget (pathological aspect ratios only). ---
    w_row_f32 = _round_up(W, _LANE) * 4
    if sub * w_row_f32 <= target_f32_bytes:
        tw = W
    else:
        tw = max(_LANE, (target_f32_bytes // (sub * 4)) // _LANE * _LANE)
        tw = min(tw, W)
    tw_row_f32 = _round_up(tw, _LANE) * 4

    # --- sublane (second-minor) dim ---
    if _round_up(H, sub) * tw_row_f32 <= target_f32_bytes:
        th = H
    else:
        th = max(sub, (target_f32_bytes // tw_row_f32) // sub * sub)
    slab_f32 = _round_up(th, sub) * tw_row_f32

    # --- leading dim: ~target bytes per block, but never fewer than
    #     min(L, min_grid_steps) steps so both v7x TensorCores get work and
    #     the DMA<->compute<->writeback pipeline has something to overlap. ---
    tl = max(1, target_f32_bytes // slab_f32)
    tl = min(tl, pl.cdiv(L, min_grid_steps), L)

    # If the leading axis alone can't provide enough steps, split H further.
    steps_l = pl.cdiv(L, tl)
    if steps_l < min_grid_steps and th == H and H > sub:
        want = pl.cdiv(min_grid_steps, steps_l)
        th_split = _round_up(pl.cdiv(H, want), sub)
        if th_split < H:
            th = th_split

    return tl, th, tw


def hswish(
    x: jax.Array,
    *,
    target_block_bytes_f32: int = 1 * 1024 * 1024,
    min_grid_steps: int = 8,
) -> jax.Array:
    """Elementwise hard-swish, layout-preserving (no relayout around the call)."""
    dtype = x.dtype
    if not jnp.issubdtype(dtype, jnp.floating):
        raise TypeError(f"hswish kernel supports floating dtypes only, got {dtype}")

    orig_shape = x.shape

    # Normalize to a 3-D (L, H, W) view by collapsing ONLY leading dims
    # (layout-free: the tiled minor dims are untouched).
    if x.ndim == 0:
        x3 = jnp.reshape(x, (1, 1, 1))
    elif x.ndim == 1:
        x3 = jnp.reshape(x, (1, 1, x.shape[0]))
    else:
        H, W = x.shape[-2], x.shape[-1]
        L = math.prod(x.shape[:-2])
        x3 = jnp.reshape(x, (L, H, W))

    L, H, W = x3.shape
    tl, th, tw = _pick_tiles((L, H, W), dtype, target_block_bytes_f32, min_grid_steps)

    grid = (pl.cdiv(L, tl), pl.cdiv(H, th), pl.cdiv(W, tw))
    spec = pl.BlockSpec((tl, th, tw), lambda i, j, k: (i, j, k))

    out3 = pl.pallas_call(
        _hswish_kernel,
        out_shape=jax.ShapeDtypeStruct((L, H, W), dtype),
        grid=grid,
        in_specs=[spec],
        out_specs=spec,
        compiler_params=pltpu.CompilerParams(
            dimension_semantics=("parallel", "parallel", "parallel"),
            vmem_limit_bytes=32 * 1024 * 1024,
        ),
    )(x3)

    return jnp.reshape(out3, orig_shape)


def _hswish_ref(x):
    xf = x.astype(jnp.float32)
    return (xf * jnp.clip(xf + 3.0, 0.0, 6.0) / 6.0).astype(x.dtype)


if __name__ == "__main__":
    hswish_j = jax.jit(hswish)

    # NCHW activation consistent with MobileNetV3: batch=2, C=4, H=W=16.
    x = jax.random.normal(jax.random.PRNGKey(0), (2, 4, 16, 16), dtype=jnp.float32) * 4.0
    y = jax.block_until_ready(hswish_j(x))
    assert y.shape == x.shape and y.dtype == x.dtype
    assert jnp.allclose(y, _hswish_ref(x), atol=1e-5, rtol=1e-5), "f32 mismatch vs reference"

    # Odd, non-aligned shape: exercises masked ragged leading-dim blocks.
    x_odd = jax.random.normal(jax.random.PRNGKey(1), (3, 5, 7, 11), dtype=jnp.float32) * 4.0
    y_odd = jax.block_until_ready(hswish_j(x_odd))
    assert jnp.allclose(y_odd, _hswish_ref(x_odd), atol=1e-5, rtol=1e-5), "odd-shape mismatch"

    # bf16 path (16-sublane granularity, f32 compute inside the kernel).
    x_bf16 = (jax.random.normal(jax.random.PRNGKey(2), (2, 4, 16, 16)) * 4.0).astype(jnp.bfloat16)
    y_bf16 = jax.block_until_ready(hswish_j(x_bf16))
    ref_bf16 = _hswish_ref(x_bf16)
    assert y_bf16.dtype == jnp.bfloat16
    assert jnp.allclose(
        y_bf16.astype(jnp.float32), ref_bf16.astype(jnp.float32), atol=2e-2, rtol=2e-2
    ), "bf16 mismatch"

    # Shape that forces the sublane-axis split (L too small for min grid steps).
    x_h = jax.random.normal(jax.random.PRNGKey(3), (1, 1, 256, 384), dtype=jnp.float32) * 4.0
    y_h = jax.block_until_ready(hswish_j(x_h))
    assert jnp.allclose(y_h, _hswish_ref(x_h), atol=1e-5, rtol=1e-5), "H-split mismatch"

    print("KERNEL_OK")
</pallas_src>

<mosaic_0001>
module attributes {stable_mosaic.version = 11 : i64} {
  func.func @_hswish_kernel(%arg0: i32, %arg1: i32, %arg2: i32, %arg3: memref<1x16x16xf32, #tpu.memory_space<vmem>>, %arg4: memref<1x16x16xf32, #tpu.memory_space<vmem>>) attributes {dimension_semantics = [#tpu.dimension_semantics<parallel>, #tpu.dimension_semantics<parallel>, #tpu.dimension_semantics<parallel>], iteration_bounds = array<i64: 8, 1, 1>, scalar_prefetch = 0 : i64, scratch_operands = 0 : i64, tpu.core_type = #tpu.core_type<tc>, window_params = [{transform_indices = @transform_0, window_bounds = array<i64: 1, 16, 16>}, {transform_indices = @transform_1, window_bounds = array<i64: 1, 16, 16>}]} {
    %c0 = arith.constant 0 : index
    %c0_0 = arith.constant 0 : index
    %c0_1 = arith.constant 0 : index
    %0 = vector.load %arg3[%c0, %c0_0, %c0_1] : memref<1x16x16xf32, #tpu.memory_space<vmem>>, vector<1x16x16xf32>
    %cst = arith.constant 3.000000e+00 : f32
    %1 = vector.broadcast %cst : f32 to vector<1x16x16xf32>
    %2 = arith.addf %0, %1 : vector<1x16x16xf32>
    %cst_2 = arith.constant 0.000000e+00 : f32
    %cst_3 = arith.constant 6.000000e+00 : f32
    %3 = vector.broadcast %cst_2 : f32 to vector<1x16x16xf32>
    %4 = arith.maximumf %3, %2 : vector<1x16x16xf32>
    %5 = vector.broadcast %cst_3 : f32 to vector<1x16x16xf32>
    %6 = arith.minimumf %5, %4 : vector<1x16x16xf32>
    %7 = arith.mulf %0, %6 : vector<1x16x16xf32>
    %cst_4 = arith.constant 0.166666672 : f32
    %8 = vector.broadcast %cst_4 : f32 to vector<1x16x16xf32>
    %9 = arith.mulf %7, %8 : vector<1x16x16xf32>
    %c0_5 = arith.constant 0 : index
    %c0_6 = arith.constant 0 : index
    %c0_7 = arith.constant 0 : index
    %10 = vector.load %arg4[%c0_5, %c0_6, %c0_7] : memref<1x16x16xf32, #tpu.memory_space<vmem>>, vector<1x16x16xf32>
    tpu.vector_store %arg4[%c0_5, %c0_6, %c0_7], %9 {strides = array<i32>} : memref<1x16x16xf32, #tpu.memory_space<vmem>>, vector<1x16x16xf32>,
    return
  }
  func.func @transform_0(%arg0: i32, %arg1: i32, %arg2: i32) -> (i32, i32, i32) {
    %c0_i32 = arith.constant 0 : i32
    return %arg0, %arg1, %arg2 : i32, i32, i32
  }
  func.func @transform_1(%arg0: i32, %arg1: i32, %arg2: i32) -> (i32, i32, i32) {
    %c0_i32 = arith.constant 0 : i32
    return %arg0, %arg1, %arg2 : i32, i32, i32
  }
}

</mosaic_0001>

<bundles_post_ra>
// kernel: hswish.1
= control target key start
LH: loop header
LB: loop body
LE: loop exit
PB: predicated region body
PF: predicated region fallthrough
CT: control target
= control target key end

     0   :  { %6 = vsyncpa [#allocation3], 0  ;;  %s677_s0 = inlined_call_operand.hbm [shape: f32[8,16,16], index: 0, kind: input, shape index: {}]   ;;  %s678_s1 = inlined_call_operand.hbm [shape: f32[8,16,16], index: 1, kind: output, shape index: {}]  }
   0x1   :  { %8 = vsyncpa [#allocation3 + $0x1], 0 }
   0x2   :  { %9 = vsyncpa [#allocation4], 0 }
   0x3   :  { %11 = vsyncpa [#allocation4 + $0x1], 0  ;;  %s504_s6 = smov 0   ;;  %s506_s7 = smov 0  }
   0x4   :  { %s508_s8 = smov 0   ;;  %s510_s9 = smov 0  }
   0x5   :  { %s512_s10 = smov 0   ;;  %s514_s11 = smov 0  }
   0x6 LB: > { %s291_s12 = sadd.s32 4294967295, %s486_s11   ;;  %s292_s13 = sadd.s32 4294967294, %s486_s11   ;;  %s486_s11 = sphi %s514_s11, %s17_s11   ;;  %s482_s10 = sphi %s512_s10, %s692_s10   ;;  %s478_s9 = sphi %s510_s9, %s691_s9   ;;  %s474_s8 = sphi %s508_s8, %s690_s8   ;;  %s470_s7 = sphi %s506_s7, %s689_s7   ;;  %s466_s6 = sphi %s504_s6, %s688_s6  }
   0x7   : > { %s36_s14 = sadd.s32 1, %s482_s10  ;;  %s47_s15 = sadd.s32 1, %s474_s8 }
   0x8   : > { %p38_p0 = scmp.ge.s32.totalorder %s36_s14, 8  ;;  %p54_p1 = scmp.ne.s32.totalorder %s474_s8, %s470_s7 }
   0x9   : > { %p55_p2 = scmp.eq.s32.totalorder %s486_s11, 0  ;;  %p60_p3 = scmp.ne.s32.totalorder %s470_s7, %s466_s6 }
   0xa   : > { %s694_s14 = smov (%p38_p0, %s36_s14), 0  ;;  %p61_p5 = scmp.eq.s32.totalorder %s291_s12, 0 }
   0xb   : > { %p545_p4 = por %p55_p2, %p54_p1  ;;  %s40_s17 = ssub.s32 %s482_s10, %s694_s14 }
   0xc   : > { %p88_p6 = scmp.eq.s32.totalorder %s291_s12, 7  ;;  %p45_p7 = scmp.eq.s32.totalorder %s40_s17, 0 }
   0xd   : > { %p551_p8 = por %p61_p5, %p60_p3  ;;  %p94_p10 = scmp.eq.s32.totalorder %s292_s13, 7 }
   0xe   : > { %p555_p9 = por %p88_p6, %p54_p1  ;;  %p320_p12 = scmp.lt.s32.totalorder %s486_s11, 8 }
   0xf   : > { %s560_s20 = scalar_select %p45_p7, %s474_s8, %s47_s15  }
  0x10   : > { %s682_s19 = scalar_select %p555_p9, 1, 0 }
  0x11   : > { %p562_p11 = por %p94_p10, %p60_p3  ;;  %s114_s22 = sand.u32 1, %s474_s8  }
  0x12   : > { %s295_s23 = sshll.u32 %s114_s22, 4  ;;  %s306_s24 = sshll.u32 %s482_s10, 8 }
  0x13   : > { %s683_s21 = scalar_select %p562_p11, 1, 0 }
  0x14   : > { %s572_s27 = scalar_lea.hbm %s677_s0, %s306_s24  ;;  %s118_s28 = scalar_lea.vmem [#allocation2], %s295_s23 }
  0x15   : > { %s128_s29 = sshll.u32 %s118_s28, 4  ;;  %p578_p13 = pnand %p320_p12, %p545_p4  ;;  %s574_s29 = int_to_ptr.vmem [resolvable:$true] %s128_s29 }
  0x16   : > { %s583_s2 = scalar_lea.sflag [#allocation3], %s114_s22  ;;  %s374_s3 = scalar_lea.hbm %s572_s27, 256 }
  0x17   : > { %p375_p1 = scmp.ne.s32.totalorder %s572_s27, %s374_s3  ;;  %p376_p2 = pneg %p578_p13 }
  0x18   : > { %s379_s12 = scalar_lea.hbm %s677_s0, 2048  ;;  %p380_p4 = scmp.lt.u32.totalorder %s572_s27, %s677_s0 }
  0x19   : > { %p377_p3 = pnand %p376_p2, %p375_p1  ;;  %p381_p6 = scmp.lt.u32.totalorder %s379_s12, %s374_s3 }
  0x1a   : > { %p383_p10 = scmp.lt.u32.totalorder %s374_s3, %s572_s27 }
  0x1b   : > { %p378_p5 = pneg %p377_p3  ;;  %p382_p7 = por %p381_p6, %p380_p4 }
  0x1d   : > { %p384_p12 = por %p383_p10, %p382_p7 }
  0x1f   : > { %p385_p0 = pnand %p384_p12, %p378_p5 }
  0x21   : > { %388 = shalt.err (!%p385_p0)
}
  0x22   : > { %s389_s16 = scalar_lea.vmem %s574_s29, 256  ;;  %s488_s17 = smov [#allocation2]  }
  0x23   : > { %p390_p1 = scmp.ne.s32.totalorder %s574_s29, %s389_s16  ;;  %s394_s22 = sshll.u32 %s488_s17, 4  ;;  %s395_s22 = int_to_ptr.vmem [resolvable:$false] %s394_s22 }
  0x24   : > { %s396_s23 = scalar_lea.vmem %s395_s22, 512  ;;  %p397_p9 = scmp.lt.s32.totalorder %s574_s29, %s395_s22 }
  0x25   : > { %p392_p3 = pnand %p390_p1, %p376_p2  ;;  %p398_p4 = scmp.lt.s32.totalorder %s396_s23, %s389_s16 }
  0x27   : > { %p393_p11 = pneg %p392_p3  ;;  %p399_p6 = por %p398_p4, %p397_p9 }
  0x29   : > { %p400_p7 = pnand %p399_p6, %p393_p11 }
  0x2b   : > { %403 = shalt.err (!%p400_p7)
}
  0x2c   : > { %s489_s24 = smov 128   ;;  %s490_s25 = smov 8  }
  0x2d   : > { %315 = dma.hbm_to_vmem [thread:$0]  (!%p578_p13), %s572_s27, 256, %s574_s29, %s583_s2, %s489_s24, %s489_s24, %s490_s25  }
  0x2e   : > { %p136_p0 = scmp.lt.s32.totalorder %s486_s11, 9  ;;  %p685_p2 = scmp.ge.s32.totalorder %s486_s11, 1 }
  0x30   : > { %p137_p5 = pnand %p685_p2, %p136_p0 }
  0x31   : > { %s615_s26 = sand.u32 (!%p137_p5), 1, %s470_s7  }
  0x32   : > { %140 = sbr.rel (%p137_p5) target bundleno = 85 (0x55), region = 24  ;;  %s299_s28 = sshll.u32 (!%p137_p5), %s615_s26, 4 }
  0x33   : > { %s143_s3 = scalar_lea.sflag (!%p137_p5), [#allocation3], %s615_s26  ;;  %s146_s4 = scalar_lea.vmem (!%p137_p5), [#allocation2], %s299_s28 }
  0x39   : > { %457 = dma.done.wait (%p551_p8), %s143_s3, 256  }
  0x3a   : > { %459 = vsyncadd (%p551_p8), %s143_s3, 4294967040  ;;  %v167_v0 = vld [vmem:[%s146_s4] sm:$0xff]  ;;  %v168_v1 = vld [vmem:[%s146_s4 + $0x8] sm:$0xff]  ;;  %s164_s27 = scalar_lea.vmem [#allocation5], %s299_s28  ;;  %s307_s30 = sshll.u32 %s478_s9, 8  ;;  %vm179_vm0 = vcmask 130048  }
  0x3b   : > { %v169_v2 = vadd.f32 3.0, %v167_v0  ;;  %v170_v3 = vadd.f32 3.0, %v168_v1  ;;  %s199_s29 = sshll.u32 %s164_s27, 4  ;;  %s629_s5 = scalar_lea.hbm %s678_s1, %s307_s30  ;;  %s624_s29 = int_to_ptr.vmem [resolvable:$true] %s199_s29 }
  0x3c   : > { %s183_s12 = scalar_lea.sflag [#allocation4], %s615_s26  ;;  %s404_s13 = scalar_lea.vmem %s624_s29, 256 }
  0x3d   : > { %v171_v4 = vmax.f32 %v169_v2, 0.0  ;;  %v172_v5 = vmax.f32 %v170_v3, 0.0  ;;  %p405_p8 = scmp.ne.s32.totalorder %s624_s29, %s404_s13  ;;  %p686_p9 = scmp.ne.s32.totalorder %s682_s19, 0 }
  0x3e   : > { %s491_s9 = smov [#allocation5]  }
  0x3f   : > { %v173_v6 = vmin.f32 %v171_v4, 6.0  ;;  %v174_v7 = vmin.f32 %v172_v5, 6.0  ;;  %p406_p11 = pnand %p405_p8, %p686_p9  ;;  %s408_s15 = sshll.u32 %s491_s9, 4  ;;  %s409_s15 = int_to_ptr.vmem [resolvable:$false] %s408_s15 }
  0x40   : > { %s410_s16 = scalar_lea.vmem %s409_s15, 512  ;;  %p411_p10 = scmp.lt.s32.totalorder %s624_s29, %s409_s15 }
  0x41   : > { %v175_v8 = vmul.f32 %v173_v6, %v167_v0  ;;  %v176_v9 = vmul.f32 %v174_v7, %v168_v1  ;;  %p407_p13 = pneg %p406_p11  ;;  %p412_p12 = scmp.lt.s32.totalorder %s410_s16, %s404_s13 }
  0x43   : > { %v177_v10 = vmul.f32 0.16666667, %v175_v8  ;;  %v178_v11 = vmul.f32 0.16666667, %v176_v9  ;;  %p413_p1 = por %p412_p12, %p411_p10 }
  0x45   : > { %180 = vst.msk [vmem:[%s164_s27] sm:$0xff] %vm179_vm0, %v177_v10  ;;  %181 = vst.msk [vmem:[%s164_s27 + $0x8] sm:$0xff] %vm179_vm0, %v178_v11  ;;  %p414_p3 = pnand %p413_p1, %p407_p13 }
  0x47   : > { %417 = shalt.err (!%p414_p3)
}
  0x48   : > { %s418_s17 = scalar_lea.hbm %s629_s5, 256  ;;  %s422_s24 = scalar_lea.hbm %s678_s1, 2048 }
  0x49   : > { %p419_p4 = scmp.ne.s32.totalorder %s629_s5, %s418_s17  ;;  %p423_p0 = scmp.lt.u32.totalorder %s629_s5, %s678_s1 }
  0x4a   : > { %p424_p2 = scmp.lt.u32.totalorder %s422_s24, %s418_s17  ;;  %p426_p8 = scmp.lt.u32.totalorder %s418_s17, %s629_s5 }
  0x4b   : > { %p420_p6 = pnand %p419_p4, %p686_p9 }
  0x4c   : > { %p425_p5 = por %p424_p2, %p423_p0 }
  0x4d   : > { %p421_p7 = pneg %p420_p6 }
  0x4e   : > { %p427_p11 = por %p426_p8, %p425_p5 }
  0x50   : > { %p428_p13 = pnand %p427_p11, %p421_p7 }
  0x52   : > { %431 = shalt.err (!%p428_p13)
}
  0x53   : > { %s492_s3 = smov 128   ;;  %s493_s4 = smov 8  }
  0x54   : > { %310 = dma.vmem_to_hbm [thread:$0]  (%p686_p9), %s624_s29, 256, %s629_s5, %s183_s12, %s492_s3, %s492_s3, %s493_s4  }
  0x55 PF: > { %p321_p10 = scmp.ge.s32.totalorder %s486_s11, 2  ;;  %s214_s27 = sand.u32 1, %s466_s6  }
  0x56   : > { %p687_p12 = scmp.ne.s32.totalorder %s683_s21, 0  ;;  %s215_s30 = scalar_lea.sflag [#allocation4], %s214_s27 }
  0x58   : > { %p317_p1 = pnand %p321_p10, %p687_p12 }
  0x5a   : > { %461 = dma.done.wait (!%p317_p1), %s215_s30, 256  }
  0x5b   : > { %463 = vsyncadd (!%p317_p1), %s215_s30, 4294967040  ;;  %s17_s11 = sadd.s32 1, %s486_s11   ;;  %s688_s6 = smov %s470_s7 }
  0x5c   : > { %p14_p3 = scmp.ge.s32.totalorder %s17_s11, 10   ;;  %s689_s7 = smov %s474_s8 }
  0x5d   : > { %s690_s8 = smov %s560_s20  ;;  %s691_s9 = smov %s482_s10 }
  0x5e   : > { %s692_s10 = smov %s694_s14  ;;  %16 = sbr.rel (!%p14_p3) target bundleno = 6 (0x6), region = 69 }
  0x65   :  { %220 = vsyncpa [#allocation3], 1 }
  0x66   :  { %222 = vsyncpa [#allocation3 + $0x1], 1 }
  0x67   :  { %223 = vsyncpa [#allocation4], 1 }
  0x68   :  { %225 = vsyncpa [#allocation4 + $0x1], 1 }

</bundles_post_ra>
